<compile_context>
chip_gen: v5e
topology: v5e:2x2
jax: 0.10.0
libtpu: 0.0.40
codegen_flags: <defaults>
</compile_context>

<pallas_src>
import functools

import jax
import jax.numpy as jnp
from jax import lax
from jax.experimental import pallas as pl
from jax.experimental.pallas import tpu as pltpu


def _simloss_kernel(lhs_ref, rhs_hbm_ref, loss_ref, rhs_vmem, copy_sem, *,
                    inv_temp, batch, inv_n):
    """Processes one (tm, 2B) row slab of the similarity matrix per grid step."""
    i = pl.program_id(0)
    tm = lhs_ref.shape[0]
    n = rhs_vmem.shape[1]

    # One-time fetch of the whole pre-transposed (D, 2B) RHS into a
    # single-buffered VMEM scratch (no BlockSpec double buffering of an
    # invariant operand).
    @pl.when(i == 0)
    def _fetch_rhs():
        cp = pltpu.make_async_copy(rhs_hbm_ref, rhs_vmem, copy_sem)
        cp.start()
        cp.wait()

    # (tm, D) @ (D, 2B) on the MXU with f32 accumulation; 1/temp applied after.
    sim = jnp.dot(lhs_ref[...], rhs_vmem[...],
                  preferred_element_type=jnp.float32) * inv_temp      # (tm, 2B)

    row_g = lax.broadcasted_iota(jnp.int32, (tm, 1), 0) + i * tm      # global row ids
    col = lax.broadcasted_iota(jnp.int32, (tm, n), 1)

    # Positive pair sim[r, (r + B) mod 2B], pulled straight out of the slab
    # (exactly what the reference's diag(sim, +/-B) reads).
    pos_col = (row_g + batch) % n
    pos = jnp.sum(jnp.where(col == pos_col, sim, 0.0), axis=-1, keepdims=True)

    # Diagonal-masked, max-stabilized log-sum-exp over j != r.
    sim_masked = jnp.where(col == row_g, -1e30, sim)
    m = jnp.max(sim_masked, axis=-1, keepdims=True)
    denom = jnp.sum(jnp.exp(sim_masked - m), axis=-1, keepdims=True)   # >= 1
    log_denom = m + jnp.log(denom)

    # -log(exp(pos) / denom) == log(denom) - pos
    block_loss = jnp.sum(log_denom - pos)

    @pl.when(i == 0)
    def _first():
        loss_ref[0, 0] = block_loss

    @pl.when(i > 0)
    def _accumulate():
        loss_ref[0, 0] = loss_ref[0, 0] + block_loss

    @pl.when(i == pl.num_programs(0) - 1)
    def _finalize():
        loss_ref[0, 0] = loss_ref[0, 0] * inv_n


def _vmem_capacity_bytes():
    try:
        return int(pltpu.get_tpu_info().vmem_capacity_bytes)
    except Exception:
        return 64 << 20          # conservative: v7x has 64 MiB per TensorCore


def _pick_block_rows(n, d, itemsize, vmem_budget, max_rows=512):
    """Largest tm dividing n (aligned for the dtype) whose working set fits VMEM."""
    align = 16 if itemsize < 4 else 8            # bf16 packs 2 rows per sublane
    cands = [tm for tm in range(align, min(n, max_rows) + 1, align) if n % tm == 0]
    if not cands:
        return n                                  # full-dim block: always layout-legal
    for tm in sorted(cands, reverse=True):
        peak = (n * d * itemsize                  # resident (D, 2B) RHS, single buffer
                + 2 * tm * d * itemsize           # double-buffered LHS row stream
                + 6 * tm * n * 4)                 # f32/int32 slab temporaries
        if peak <= vmem_budget:
            return tm
    return min(cands)


def sim_loss(output1, output2, temp=0.7, *, block_rows=None, mxu_dtype=None,
             interpret=False):
    """Pallas TPU implementation of SimLoss.forward.  output1/output2: (B, D)."""
    B, D = output1.shape
    assert output2.shape == (B, D)
    n = 2 * B

    # f32 default keeps fidelity with the reference; bf16 halves MXU/DMA bytes
    # on v5e/v6e/v7x (elementwise/reduction math stays f32 either way).
    if mxu_dtype is None:
        mxu_dtype = output1.dtype
    itemsize = jnp.dtype(mxu_dtype).itemsize

    # Concatenate once in the wrapper (plain XLA); also build the (D, 2B)
    # transpose once so the kernel matmul is a standard (tm,D)@(D,2B).
    out = jnp.concatenate([output1, output2], axis=0).astype(mxu_dtype)   # (2B, D)
    rhs_t = out.T                                                         # (D, 2B)

    cap = _vmem_capacity_bytes()
    vmem_limit = int(min(cap * 3 // 4, 96 << 20))
    if block_rows is None:
        tm = _pick_block_rows(n, D, itemsize, int(vmem_limit * 0.85))
    else:
        tm = block_rows
    assert n % tm == 0, "block_rows must divide 2 * batch_size"
    nb = n // tm

    kernel = functools.partial(
        _simloss_kernel, inv_temp=1.0 / float(temp), batch=B, inv_n=1.0 / float(n))

    loss = pl.pallas_call(
        kernel,
        out_shape=jax.ShapeDtypeStruct((1, 1), jnp.float32),
        grid=(nb,),
        in_specs=[
            # (tm, D) row slab of the LHS, streamed (and double-buffered) by Pallas.
            pl.BlockSpec((tm, D), lambda i: (i, 0)),
            # Full (D, 2B) RHS stays in HBM; copied once into VMEM scratch.
            pl.BlockSpec(memory_space=pl.ANY),
        ],
        out_specs=pl.BlockSpec(memory_space=pltpu.MemorySpace.SMEM),
        scratch_shapes=[
            pltpu.VMEM((D, n), mxu_dtype),     # single-buffered resident RHS
            pltpu.SemaphoreType.DMA,           # semaphore for the one-time copy
        ],
        compiler_params=pltpu.CompilerParams(
            # Sequential accumulation into the SMEM output -> arbitrary axis.
            dimension_semantics=("arbitrary",),
            vmem_limit_bytes=vmem_limit,
        ),
        interpret=interpret,
    )(out, rhs_t)
    return loss[0, 0]


if __name__ == "__main__":
    B, D = 8, 32
    key = jax.random.PRNGKey(0)
    k1, k2 = jax.random.split(key)
    output1 = jax.random.normal(k1, (B, D), dtype=jnp.float32)
    output2 = jax.random.normal(k2, (B, D), dtype=jnp.float32)
    temp = 0.7

    loss = sim_loss(output1, output2, temp=temp)
    jax.block_until_ready(loss)

    # Pure-JAX reference (same math as the PyTorch forward, incl. the ~eye mask).
    out = jnp.concatenate([output1, output2], axis=0)
    sim = jnp.matmul(out, out.T, precision="highest") / temp
    pos = jnp.concatenate([jnp.diagonal(sim, B), jnp.diagonal(sim, -B)])
    mask = 1.0 - jnp.eye(2 * B, dtype=jnp.float32)
    denom = jnp.sum(jnp.exp(sim) * mask, axis=-1)
    ref = jnp.mean(-jnp.log(jnp.exp(pos) / denom))

    # Tolerances account for MXU f32 matmul pass decomposition vs. XLA.
    assert jnp.allclose(loss, ref, rtol=2e-2, atol=5e-2), (loss, ref)

    # bf16 MXU-operand fast path (v6e/v7x); elementwise math stays f32.
    loss_bf16 = sim_loss(output1, output2, temp=temp, mxu_dtype=jnp.bfloat16)
    jax.block_until_ready(loss_bf16)
    assert jnp.allclose(loss_bf16, ref, rtol=5e-2, atol=1e-1), (loss_bf16, ref)

    print("KERNEL_OK")
</pallas_src>

<mosaic_0001>
module attributes {stable_mosaic.version = 11 : i64} {
  func.func @_simloss_kernel(%arg0: i32, %arg1: memref<16x32xf32, #tpu.memory_space<vmem>>, %arg2: memref<32x16xf32, #tpu.memory_space<any>>, %arg3: memref<1x1xf32, #tpu.memory_space<smem>>, %arg4: memref<32x16xf32, #tpu.memory_space<vmem>>, %arg5: memref<!tpu.dma_semaphore, #tpu.memory_space<semaphore_mem>>) attributes {dimension_semantics = [#tpu.dimension_semantics<arbitrary>], iteration_bounds = array<i64: 1>, scalar_prefetch = 0 : i64, scratch_operands = 2 : i64, tpu.core_type = #tpu.core_type<tc>, window_params = [{transform_indices = @transform_0, window_bounds = array<i64: 16, 32>}, {}, {transform_indices = @transform_2, window_bounds = array<i64: 1, 1>}]} {
    %c0_i32 = arith.constant 0 : i32
    %0 = arith.cmpi eq, %arg0, %c0_i32 : i32
    %1 = arith.extui %0 : i1 to i32
    %c0_i32_0 = arith.constant 0 : i32
    %2 = arith.cmpi ne, %1, %c0_i32_0 : i32
    scf.if %2 {
      tpu.enqueue_dma source(%arg2 : memref<32x16xf32, #tpu.memory_space<any>>) target(%arg4 : memref<32x16xf32, #tpu.memory_space<vmem>>) target_semaphore(%arg5 : memref<!tpu.dma_semaphore, #tpu.memory_space<semaphore_mem>>)
      tpu.wait_dma2 semaphore(%arg5 : memref<!tpu.dma_semaphore, #tpu.memory_space<semaphore_mem>>) src(%arg2 : memref<32x16xf32, #tpu.memory_space<any>>) dst(%arg4 : memref<32x16xf32, #tpu.memory_space<vmem>>)
    } else {
    }
    %c0 = arith.constant 0 : index
    %c0_1 = arith.constant 0 : index
    %3 = vector.load %arg1[%c0, %c0_1] : memref<16x32xf32, #tpu.memory_space<vmem>>, vector<16x32xf32>
    %c0_2 = arith.constant 0 : index
    %c0_3 = arith.constant 0 : index
    %4 = vector.load %arg4[%c0_2, %c0_3] : memref<32x16xf32, #tpu.memory_space<vmem>>, vector<32x16xf32>
    %cst = arith.constant dense<0.000000e+00> : vector<16x16xf32>
    %5 = tpu.matmul %3, %4, %cst {dimension_numbers = #tpu.dot_dimension_numbers<[1], [0], [0], [1], [0, 0, 1, 1], [], []>} : vector<16x32xf32>, vector<32x16xf32>, vector<16x16xf32> -> vector<16x16xf32>
    %cst_4 = arith.constant 1.42857146 : f32
    %6 = vector.broadcast %cst_4 : f32 to vector<16x16xf32>
    %7 = arith.mulf %5, %6 : vector<16x16xf32>
    %8 = tpu.iota {dimensions = array<i32: 0>} : vector<16x1xi32>
    %c16_i32 = arith.constant 16 : i32
    %9 = arith.muli %arg0, %c16_i32 : i32
    %10 = vector.broadcast %9 : i32 to vector<16x1xi32>
    %11 = arith.addi %8, %10 : vector<16x1xi32>
    %12 = tpu.iota {dimensions = array<i32: 1>} : vector<16x16xi32>
    %c8_i32 = arith.constant 8 : i32
    %13 = vector.broadcast %c8_i32 : i32 to vector<16x1xi32>
    %14 = arith.addi %11, %13 : vector<16x1xi32>
    %c16_i32_5 = arith.constant 16 : i32
    %c0_i32_6 = arith.constant 0 : i32
    %15 = arith.cmpi eq, %c16_i32_5, %c0_i32_6 : i32
    %c1_i32 = arith.constant 1 : i32
    %16 = arith.select %15, %c1_i32, %c16_i32_5 : i32
    %17 = vector.broadcast %16 : i32 to vector<16x1xi32>
    %18 = arith.remsi %14, %17 : vector<16x1xi32>
    %c0_i32_7 = arith.constant 0 : i32
    %19 = vector.broadcast %c0_i32_7 : i32 to vector<16x1xi32>
    %20 = arith.cmpi ne, %18, %19 : vector<16x1xi32>
    %c0_i32_8 = arith.constant 0 : i32
    %21 = vector.broadcast %c0_i32_8 : i32 to vector<16x1xi32>
    %22 = arith.cmpi slt, %18, %21 : vector<16x1xi32>
    %c0_i32_9 = arith.constant 0 : i32
    %23 = arith.cmpi slt, %16, %c0_i32_9 : i32
    %24 = vector.broadcast %23 : i1 to vector<16x1xi1>
    %25 = vector.broadcast %24 : vector<16x1xi1> to vector<16x1xi1>
    %26 = arith.xori %22, %25 : vector<16x1xi1>
    %27 = arith.andi %26, %20 : vector<16x1xi1>
    %28 = vector.broadcast %16 : i32 to vector<16x1xi32>
    %29 = arith.addi %18, %28 : vector<16x1xi32>
    %30 = arith.select %27, %29, %18 : vector<16x1xi1>, vector<16x1xi32>
    %31 = vector.broadcast %30 : vector<16x1xi32> to vector<16x16xi32>
    %32 = arith.cmpi eq, %12, %31 : vector<16x16xi32>
    %cst_10 = arith.constant 0.000000e+00 : f32
    %33 = vector.broadcast %cst_10 : f32 to vector<16x16xf32>
    %34 = arith.select %32, %7, %33 : vector<16x16xi1>, vector<16x16xf32>
    %cst_11 = arith.constant dense<0.000000e+00> : vector<16xf32>
    %35 = vector.multi_reduction <add>, %34, %cst_11 [1] : vector<16x16xf32> to vector<16xf32>
    %36 = vector.shape_cast %35 : vector<16xf32> to vector<16x1xf32>
    %37 = vector.broadcast %11 : vector<16x1xi32> to vector<16x16xi32>
    %38 = arith.cmpi eq, %12, %37 : vector<16x16xi32>
    %cst_12 = arith.constant -1.000000e+30 : f32
    %39 = vector.broadcast %cst_12 : f32 to vector<16x16xf32>
    %40 = arith.select %38, %39, %7 : vector<16x16xi1>, vector<16x16xf32>
    %cst_13 = arith.constant dense<0xFF800000> : vector<16xf32>
    %41 = vector.multi_reduction <maximumf>, %40, %cst_13 [1] : vector<16x16xf32> to vector<16xf32>
    %42 = vector.shape_cast %41 : vector<16xf32> to vector<16x1xf32>
    %43 = vector.broadcast %42 : vector<16x1xf32> to vector<16x16xf32>
    %44 = arith.subf %40, %43 : vector<16x16xf32>
    %45 = math.exp %44 : vector<16x16xf32>
    %cst_14 = arith.constant dense<0.000000e+00> : vector<16xf32>
    %46 = vector.multi_reduction <add>, %45, %cst_14 [1] : vector<16x16xf32> to vector<16xf32>
    %47 = vector.shape_cast %46 : vector<16xf32> to vector<16x1xf32>
    %48 = math.log %47 : vector<16x1xf32>
    %49 = arith.addf %42, %48 : vector<16x1xf32>
    %50 = arith.subf %49, %36 : vector<16x1xf32>
    %51 = vector.shape_cast %50 : vector<16x1xf32> to vector<1x16x1xf32>
    %cst_15 = arith.constant dense<0.000000e+00> : vector<1xf32>
    %52 = vector.multi_reduction <add>, %51, %cst_15 [1, 2] : vector<1x16x1xf32> to vector<1xf32>
    %53 = vector.shape_cast %52 : vector<1xf32> to vector<1x1x1xf32>
    %54 = vector.extract %53[0, 0, 0] : f32 from vector<1x1x1xf32>
    %c0_i32_16 = arith.constant 0 : i32
    %55 = arith.cmpi eq, %arg0, %c0_i32_16 : i32
    %56 = arith.extui %55 : i1 to i32
    %c0_i32_17 = arith.constant 0 : i32
    %57 = arith.cmpi ne, %56, %c0_i32_17 : i32
    scf.if %57 {
      %c0_22 = arith.constant 0 : index
      %c0_23 = arith.constant 0 : index
      %64 = memref.load %arg3[%c0_22, %c0_23] : memref<1x1xf32, #tpu.memory_space<smem>>
      memref.store %54, %arg3[%c0_22, %c0_23] : memref<1x1xf32, #tpu.memory_space<smem>>
    } else {
    }
    %c0_i32_18 = arith.constant 0 : i32
    %58 = arith.cmpi sgt, %arg0, %c0_i32_18 : i32
    %59 = arith.extui %58 : i1 to i32
    %c0_i32_19 = arith.constant 0 : i32
    %60 = arith.cmpi ne, %59, %c0_i32_19 : i32
    scf.if %60 {
      %c0_22 = arith.constant 0 : index
      %c0_23 = arith.constant 0 : index
      %64 = memref.load %arg3[%c0_22, %c0_23] : memref<1x1xf32, #tpu.memory_space<smem>>
      %65 = arith.addf %64, %54 : f32
      %c0_24 = arith.constant 0 : index
      %c0_25 = arith.constant 0 : index
      %66 = memref.load %arg3[%c0_24, %c0_25] : memref<1x1xf32, #tpu.memory_space<smem>>
      memref.store %65, %arg3[%c0_24, %c0_25] : memref<1x1xf32, #tpu.memory_space<smem>>
    } else {
    }
    %c0_i32_20 = arith.constant 0 : i32
    %61 = arith.cmpi eq, %arg0, %c0_i32_20 : i32
    %62 = arith.extui %61 : i1 to i32
    %c0_i32_21 = arith.constant 0 : i32
    %63 = arith.cmpi ne, %62, %c0_i32_21 : i32
    scf.if %63 {
      %c0_22 = arith.constant 0 : index
      %c0_23 = arith.constant 0 : index
      %64 = memref.load %arg3[%c0_22, %c0_23] : memref<1x1xf32, #tpu.memory_space<smem>>
      %cst_24 = arith.constant 6.250000e-02 : f32
      %65 = arith.mulf %64, %cst_24 : f32
      %c0_25 = arith.constant 0 : index
      %c0_26 = arith.constant 0 : index
      %66 = memref.load %arg3[%c0_25, %c0_26] : memref<1x1xf32, #tpu.memory_space<smem>>
      memref.store %65, %arg3[%c0_25, %c0_26] : memref<1x1xf32, #tpu.memory_space<smem>>
    } else {
    }
    return
  }
  func.func @transform_0(%arg0: i32) -> (i32, i32) {
    %c0_i32 = arith.constant 0 : i32
    %c0_i32_0 = arith.constant 0 : i32
    return %arg0, %c0_i32 : i32, i32
  }
  func.func @transform_2(%arg0: i32) -> (i32, i32) {
    %c0_i32 = arith.constant 0 : i32
    %c0_i32_0 = arith.constant 0 : i32
    %c0_i32_1 = arith.constant 0 : i32
    return %c0_i32, %c0_i32_0 : i32, i32
  }
}

</mosaic_0001>

<bundles_post_ra>
// kernel: tpu_custom_call.1
= control target key start
LH: loop header
LB: loop body
LE: loop exit
PB: predicated region body
PF: predicated region fallthrough
CT: control target
= control target key end

     0   :  { %7 = vsyncpa [#allocation5], 0  ;;  %s290_s0 = inlined_call_operand.vmem [shape: f32[16,32], index: 0, kind: input, shape index: {}]   ;;  %s291_s1 = inlined_call_operand.vmem [shape: f32[32,16], index: 1, kind: input, shape index: {}]   ;;  %s292_s2 = inlined_call_operand.hbm [shape: f32[1,1], index: 2, kind: output, shape index: {}]  }
   0x1   :  { %v24_v0 = vld [vmem:[%s291_s1] sm:$0xff]  ;;  %v26_v1 = vld [vmem:[%s291_s1 + $0x8] sm:$0xff]  ;;  %v28_v2 = vld [vmem:[%s291_s1 + $0x10] sm:$0xff] }
   0x2   :  { %v30_v3 = vld [vmem:[%s291_s1 + $0x18] sm:$0xff] }
   0x3   :  { %37 = vsyncadd [#allocation3], 512 }
   0x4   :  { %243 = dma.done.wait [#allocation3], 512 }
   0x5   :  { %244 = vsyncadd [#allocation3], 4294966784  ;;  %66 = vmatpush.msra.mxu0 %v30_v3  ;;  %216 = vmatpush.msra.mxu1 %v30_v3  ;;  %vm47_vm0 = vcmask 261120   ;;  %v41_v4 = vld [vmem:[%s290_s0] sm:$0xff]  ;;  %v42_v5 = vld [vmem:[%s290_s0 + $0x8] sm:$0xff]  ;;  %v79_v6 = vlaneseq  ;;  %vm118_vm3 = vcmask 130048  }
   0x6   :  { %vm155_vm6 = vcmask 7168   ;;  %s193_s21 = sshll.u32 %s292_s2, 4  ;;  %s247_s24 = smov [#allocation4]   ;;  %s194_s21 = int_to_ptr.hbm [resolvable:$true] %s193_s21 }
   0x7   :  { %67 = vmatpush.msra.mxu0 %v28_v2  ;;  %217 = vmatpush.msra.mxu1 %v28_v2  ;;  %v80_v7 = vshrl.u32 %v79_v6, 7  ;;  %v87_v9 = vand.u32 127, %v79_v6 }
   0x9   :  { %68 = vmatpush.msra.mxu0 %v26_v1  ;;  %218 = vmatpush.msra.mxu1 %v26_v1  ;;  %v81_v8 = vadd.s32 8, %v80_v7  ;;  %vm125_vm1 = vcmp.eq.s32.totalorder %v87_v9, %v80_v7 }
   0xb   :  { %69 = vmatpush.msra.mxu0 %v24_v0  ;;  %219 = vmatpush.msra.mxu1 %v24_v0  ;;  %v94_v10 = vand.u32 15, %v81_v8  ;;  %v89_v11 = vadd.s32 8, %v81_v8  ;;  %vm126_vm4 = vcmp.eq.s32.totalorder %v87_v9, %v81_v8 }
   0xc   :  { %213 = vmatmul.msk.f32.vlgmr.msra.gmra.mxu0 %vm47_vm0, %v41_v4  ;;  %214 = vmatmul.msk.f32.vlgmr.msra.gmra.mxu1 %vm47_vm0, %v42_v5 }
   0xd   :  { %vm114_vm2 = vcmp.eq.s32.totalorder %v87_v9, %v94_v10  ;;  %v101_v14 = vand.u32 15, %v89_v11 }
   0xf   :  { %vm115_vm5 = vcmp.eq.s32.totalorder %v87_v9, %v101_v14 }
  0x89   :  { %v71_v12 = vpop.f32.mrf.mxu0  ;;  %v74_v13 = vpop.f32.mrf.mxu1 }
  0x8a   :  { %v77_v15 = vmul.f32 1.4285715, %v71_v12  ;;  %v78_v18 = vmul.f32 1.4285715, %v74_v13 }
  0x8c   :  { %v127_v16 = vsel %vm125_vm1, -1e+30, %v77_v15  ;;  %v116_v17 = vsel %vm114_vm2, %v77_v15, 0.0  ;;  %v128_v21 = vsel %vm126_vm4, -1e+30, %v78_v18  ;;  %v117_v22 = vsel %vm115_vm5, %v78_v18, 0.0 }
  0x8d   :  { %v129_v19 = vsel %vm118_vm3, %v127_v16, -inf  ;;  %v119_v20 = vsel %vm118_vm3, %v116_v17, 0.0  ;;  %v132_v23 = vsel %vm118_vm3, %v128_v21, -inf  ;;  %v122_v24 = vsel %vm118_vm3, %v117_v22, 0.0 }
  0x8e   :  { %130 = vmax.xlane.f32.xlu0 %v129_v19  ;;  %120 = vadd.xlane.f32.xlu2 %v119_v20 }
  0x96   :  { %133 = vmax.xlane.f32.xlu0 %v132_v23  ;;  %123 = vadd.xlane.f32.xlu2 %v122_v24 }
 0x101   :  { %v131_v25 = vpop.xlane.xlu0 %130  ;;  %v121_v38 = vpop.xlane.xlu2 %120 }
 0x102   :  { %v135_v26 = vsub.f32 %v127_v16, %v131_v25 }
 0x104   :  { %v137_v27 = vmul.f32 1.442695, %v135_v26 }
 0x106   :  { %223 = vpow2.f32 %v137_v27 }
 0x109   :  { %v134_v28 = vpop.xlane.xlu0 %133  ;;  %v124_v45 = vpop.xlane.xlu2 %123 }
 0x10a   :  { %v136_v29 = vsub.f32 %v128_v21, %v134_v28 }
 0x10c   :  { %v224_v30 = vpop.eup %223  ;;  %v139_v31 = vmul.f32 1.442695, %v136_v29 }
 0x10d   :  { %v141_v32 = vsel %vm118_vm3, %v224_v30, 0.0 }
 0x10e   :  { %225 = vpow2.f32 %v139_v31  ;;  %142 = vadd.xlane.f32.xlu1 %v141_v32 }
 0x114   :  { %v226_v33 = vpop.eup %225 }
 0x115   :  { %v144_v34 = vsel %vm118_vm3, %v226_v33, 0.0 }
 0x116   :  { %145 = vadd.xlane.f32.xlu1 %v144_v34 }
 0x181   :  { %v143_v35 = vpop.xlane.xlu1 %142 }
 0x182   :  { %227 = vlog2.f32 %v143_v35 }
 0x188   :  { %v228_v36 = vpop.eup %227 }
 0x189   :  { %v146_v37 = vpop.xlane.xlu1 %145  ;;  %v148_v39 = vmul.f32 0.6931472, %v228_v36 }
 0x18a   :  { %229 = vlog2.f32 %v146_v37 }
 0x18b   :  { %v151_v40 = vadd.f32 %v148_v39, %v131_v25 }
 0x18d   :  { %v153_v44 = vsub.f32 %v151_v40, %v121_v38 }
 0x18f   :  { %v156_v47 = vsel %vm155_vm6, %v153_v44, 0.0 }
 0x190   :  { %v230_v41 = vpop.eup %229 }
 0x191   :  { %v150_v42 = vmul.f32 0.6931472, %v230_v41 }
 0x193   :  { %v152_v43 = vadd.f32 %v150_v42, %v134_v28 }
 0x195   :  { %v154_v46 = vsub.f32 %v152_v43, %v124_v45 }
 0x197   :  { %v157_v48 = vsel %vm155_vm6, %v154_v46, 0.0 }
 0x198   :  { %v158_v49 = vadd.f32 %v157_v48, %v156_v47 }
 0x19a   :  { %159 = vadd.xlane.f32.xlu0 %v158_v49 }
 0x20d   :  { %v160_v50 = vpop.xlane.xlu0 %159 }
 0x20e   :  { %v161_v51 = vrot.slane %v160_v50, 4 }
 0x210   :  { %v162_v52 = vadd.f32 %v161_v51, %v160_v50 }
 0x212   :  { %v163_v53 = vrot.slane %v162_v52, 2 }
 0x214   :  { %v164_v54 = vadd.f32 %v163_v53, %v162_v52 }
 0x216   :  { %v165_v55 = vrot.slane %v164_v54, 1 }
 0x218   :  { %v166_v56 = vadd.f32 %v165_v55, %v164_v54 }
 0x21a   :  { %220 = vpush %v166_v56 }
 0x24b   :  { %s221_s22 = spop %220 }
 0x24c   :  { %s185_s23 = smul.f32 0.0625, %s221_s22 }
 0x24e   :  { %187 = sst [smem:[#allocation4]] %s185_s23 }
 0x24f   :  { %196 = dma.smem_to_hbm %s247_s24, 16, %s194_s21, [#allocation5]  }
 0x250   :  { %245 = dma.done.wait [#allocation5], 16  }
 0x251   :  { %246 = vsyncadd [#allocation5], 4294967280 }
 0x252   :  { %201 = sfence }
 0x253   :  { %202 = vsyncpa [#allocation5], 1 }
 0x254   :  { %203 = vsyncmov [#allocation3] }
 0x257   :  { %s204_s25 = vpop.sfrf %203 }
 0x258   :  { %p215_p0 = scmp.ne.s32.totalorder %s204_s25, 0 }
 0x25a   :  { %208 = shalt.err (%p215_p0)  }

</bundles_post_ra>
